<compile_context>
chip_gen: v7x
topology: tpu7x:2x2x1
jax: 0.10.0
libtpu: 0.0.40
codegen_flags: <defaults>
</compile_context>

<pallas_src>
import functools

import jax
import jax.numpy as jnp
from jax.experimental import pallas as pl
from jax.experimental.pallas import tpu as pltpu

INP = 784
LAYERS = [128, 128, 128]
NUM_CLASSES = 10
NUM_CLASSES_PAD = 128          # lane-dense output width
NEG_BIG = -1e30                # bias for padded classifier columns


def mlp_kernel(x_ref, w1_ref, b1_ref, w2_ref, b2_ref, w3_ref, b3_ref,
               w4_ref, b4_ref, o_ref):
    # Input arrives in its original dtype (f32); cast to bf16 in-kernel so the
    # wrapper never does a separate full-HBM cast pass.
    x = x_ref[...].astype(jnp.bfloat16)

    # Hidden layers: Linear -> ReLU.  bf16 operands, f32 accumulation on the
    # MXU; bias-add/ReLU stay in f32 (v5e has no bf16 VALU path), then recast
    # to bf16 to keep MXU throughput doubled.
    h = jnp.dot(x, w1_ref[...], preferred_element_type=jnp.float32)
    h = jnp.maximum(h + b1_ref[...], 0.0).astype(jnp.bfloat16)

    h = jnp.dot(h, w2_ref[...], preferred_element_type=jnp.float32)
    h = jnp.maximum(h + b2_ref[...], 0.0).astype(jnp.bfloat16)

    h = jnp.dot(h, w3_ref[...], preferred_element_type=jnp.float32)
    h = jnp.maximum(h + b3_ref[...], 0.0).astype(jnp.bfloat16)

    # Output layer: Linear -> Softmax over 128 padded lanes (padded logits are
    # -1e30, so exp(pad - m) underflows to exact 0 and the 10-class softmax is
    # unchanged).
    logits = jnp.dot(h, w4_ref[...], preferred_element_type=jnp.float32)
    logits = logits + b4_ref[...]
    m = jnp.max(logits, axis=-1, keepdims=True)
    e = jnp.exp(logits - m)
    denom = jnp.sum(e, axis=-1, keepdims=True)
    # Exact reciprocal keeps row sums == 1 to ~1e-7 before the bf16 store.
    o_ref[...] = (e * pl.reciprocal(denom, approx=False)).astype(o_ref.dtype)


def _round_up(n, m):
    return ((n + m - 1) // m) * m


def _pick_tile(batch, requested):
    """Largest tile <= requested that keeps a full MXU M dim (multiple of 256),
    leaves >= 2 parallel grid steps on large batches (v7x has 2 TensorCores),
    and never exceeds the sublane-rounded batch."""
    half = -(-batch // 2)
    tile = min(requested, _round_up(half, 256))
    tile = min(tile, _round_up(batch, 8))
    return max(8, _round_up(tile, 8))


@functools.partial(jax.jit, static_argnames=("batch_tile",))
def mlp_forward(x, params, batch_tile=1024):
    """x: (B, C, H, W) or (B, INP). Flatten (torch.nn.Flatten) happens here."""
    b = x.shape[0]
    x2 = x.reshape(b, -1)                      # layout no-op for contiguous x
    assert x2.shape[1] == INP

    tile = _pick_tile(b, batch_tile)
    n_tiles = pl.cdiv(b, tile)                 # ragged tail handled by pipeline

    (w1, b1), (w2, b2), (w3, b3), (w4, b4) = params

    # bf16 weights (half the HBM weight bytes, 2x MXU rate); f32 biases as
    # lane-dense (1, N) rows so the kernel adds them without a broadcast op.
    def cvt(w, bias):
        return w.astype(jnp.bfloat16), bias.reshape(1, -1).astype(jnp.float32)

    w1, b1 = cvt(w1, b1)
    w2, b2 = cvt(w2, b2)
    w3, b3 = cvt(w3, b3)

    # Pad the classifier to 128 output lanes: zero weight columns and a large
    # negative bias so the padded logits vanish under softmax.
    pad = NUM_CLASSES_PAD - NUM_CLASSES
    w4p = jnp.pad(w4.astype(jnp.bfloat16), ((0, 0), (0, pad)))
    b4p = jnp.concatenate(
        [b4.astype(jnp.float32), jnp.full((pad,), NEG_BIG, jnp.float32)]
    ).reshape(1, -1)

    def full(arr):
        nd = arr.ndim
        return pl.BlockSpec(arr.shape, lambda i, _nd=nd: (0,) * _nd)

    out = pl.pallas_call(
        mlp_kernel,
        out_shape=jax.ShapeDtypeStruct((b, NUM_CLASSES_PAD), jnp.bfloat16),
        grid_spec=pltpu.PrefetchScalarGridSpec(
            num_scalar_prefetch=0,
            grid=(n_tiles,),
            in_specs=[
                pl.BlockSpec((tile, INP), lambda i: (i, 0)),
                full(w1), full(b1),
                full(w2), full(b2),
                full(w3), full(b3),
                full(w4p), full(b4p),
            ],
            out_specs=pl.BlockSpec((tile, NUM_CLASSES_PAD), lambda i: (i, 0)),
        ),
        compiler_params=pltpu.CompilerParams(
            dimension_semantics=("parallel",),
            # Working set at tile=1024 is ~8 MiB (f32 input double-buffered +
            # resident weights + bf16 output); 32 MiB leaves headroom on v7x.
            vmem_limit_bytes=32 * 1024 * 1024,
        ),
    )(x2, w1, b1, w2, b2, w3, b3, w4p, b4p)

    # Slice the 10 real classes from the bf16 lane-padded block; only the tiny
    # (b, 10) result is cast back to f32 to match the torch module's dtype.
    return out[:, :NUM_CLASSES].astype(jnp.float32)


def init_params(key):
    """Deterministic init mirroring torch Linear shapes (stored as (in, out))."""
    dims = [INP] + LAYERS + [NUM_CLASSES]
    params = []
    for fan_in, fan_out in zip(dims[:-1], dims[1:]):
        key, kw, kb = jax.random.split(key, 3)
        bound = 1.0 / jnp.sqrt(fan_in)
        w = jax.random.uniform(kw, (fan_in, fan_out), jnp.float32, -bound, bound)
        bias = jax.random.uniform(kb, (fan_out,), jnp.float32, -bound, bound)
        params.append((w, bias))
    return params


def mlp_reference(x, params):
    """Pure-JAX f32 reference of the torch module's forward."""
    h = x.reshape(x.shape[0], -1)
    for w, bias in params[:-1]:
        h = jnp.maximum(h @ w + bias, 0.0)
    w, bias = params[-1]
    return jax.nn.softmax(h @ w + bias, axis=-1)


if __name__ == "__main__":
    key = jax.random.PRNGKey(0)
    key, kx = jax.random.split(key)
    # Small MNIST-like input: (batch=8, channels=1, 28, 28) -> flattened 784.
    x = jax.random.normal(kx, (8, 1, 28, 28), jnp.float32)
    params = init_params(key)

    out = jax.block_until_ready(mlp_forward(x, params))

    # Sanity: shape, softmax row sums, and loose parity with the f32 reference
    # (bf16 weights/activations -> ~1e-2 relative deviation is expected).
    assert out.shape == (8, NUM_CLASSES)
    assert bool(jnp.allclose(jnp.sum(out, axis=1), 1.0, atol=1e-2))
    ref = mlp_reference(x, params)
    assert bool(jnp.max(jnp.abs(out - ref)) < 5e-2)
    print("KERNEL_OK")
</pallas_src>

<mosaic_0001>
module attributes {stable_mosaic.version = 11 : i64} {
  func.func @mlp_kernel(%arg0: i32, %arg1: memref<8x784xf32, #tpu.memory_space<vmem>>, %arg2: memref<784x128xbf16, #tpu.memory_space<vmem>>, %arg3: memref<1x128xf32, #tpu.memory_space<vmem>>, %arg4: memref<128x128xbf16, #tpu.memory_space<vmem>>, %arg5: memref<1x128xf32, #tpu.memory_space<vmem>>, %arg6: memref<128x128xbf16, #tpu.memory_space<vmem>>, %arg7: memref<1x128xf32, #tpu.memory_space<vmem>>, %arg8: memref<128x128xbf16, #tpu.memory_space<vmem>>, %arg9: memref<1x128xf32, #tpu.memory_space<vmem>>, %arg10: memref<8x128xbf16, #tpu.memory_space<vmem>>) attributes {dimension_semantics = [#tpu.dimension_semantics<parallel>], iteration_bounds = array<i64: 1>, scalar_prefetch = 0 : i64, scratch_operands = 0 : i64, tpu.core_type = #tpu.core_type<tc>, window_params = [{transform_indices = @transform_0, window_bounds = array<i64: 8, 784>}, {pipeline_mode = #tpu.pipeline_mode<synchronous>, transform_indices = @transform_1, window_bounds = array<i64: 784, 128>}, {pipeline_mode = #tpu.pipeline_mode<synchronous>, transform_indices = @transform_2, window_bounds = array<i64: 1, 128>}, {pipeline_mode = #tpu.pipeline_mode<synchronous>, transform_indices = @transform_3, window_bounds = array<i64: 128, 128>}, {pipeline_mode = #tpu.pipeline_mode<synchronous>, transform_indices = @transform_4, window_bounds = array<i64: 1, 128>}, {pipeline_mode = #tpu.pipeline_mode<synchronous>, transform_indices = @transform_5, window_bounds = array<i64: 128, 128>}, {pipeline_mode = #tpu.pipeline_mode<synchronous>, transform_indices = @transform_6, window_bounds = array<i64: 1, 128>}, {pipeline_mode = #tpu.pipeline_mode<synchronous>, transform_indices = @transform_7, window_bounds = array<i64: 128, 128>}, {pipeline_mode = #tpu.pipeline_mode<synchronous>, transform_indices = @transform_8, window_bounds = array<i64: 1, 128>}, {transform_indices = @transform_9, window_bounds = array<i64: 8, 128>}]} {
    %c0 = arith.constant 0 : index
    %c0_0 = arith.constant 0 : index
    %0 = vector.load %arg1[%c0, %c0_0] : memref<8x784xf32, #tpu.memory_space<vmem>>, vector<8x784xf32>
    %1 = arith.truncf %0 : vector<8x784xf32> to vector<8x784xbf16>
    %c0_1 = arith.constant 0 : index
    %c0_2 = arith.constant 0 : index
    %2 = vector.load %arg2[%c0_1, %c0_2] : memref<784x128xbf16, #tpu.memory_space<vmem>>, vector<784x128xbf16>
    %cst = arith.constant dense<0.000000e+00> : vector<8x128xf32>
    %3 = tpu.matmul %1, %2, %cst {dimension_numbers = #tpu.dot_dimension_numbers<[1], [0], [0], [1], [0, 0, 1, 1], [], []>} : vector<8x784xbf16>, vector<784x128xbf16>, vector<8x128xf32> -> vector<8x128xf32>
    %c0_3 = arith.constant 0 : index
    %c0_4 = arith.constant 0 : index
    %4 = vector.load %arg3[%c0_3, %c0_4] : memref<1x128xf32, #tpu.memory_space<vmem>>, vector<1x128xf32>
    %5 = vector.broadcast %4 : vector<1x128xf32> to vector<8x128xf32>
    %6 = arith.addf %3, %5 : vector<8x128xf32>
    %cst_5 = arith.constant 0.000000e+00 : f32
    %7 = vector.broadcast %cst_5 : f32 to vector<8x128xf32>
    %8 = arith.maximumf %6, %7 : vector<8x128xf32>
    %9 = arith.truncf %8 : vector<8x128xf32> to vector<8x128xbf16>
    %c0_6 = arith.constant 0 : index
    %c0_7 = arith.constant 0 : index
    %10 = vector.load %arg4[%c0_6, %c0_7] : memref<128x128xbf16, #tpu.memory_space<vmem>>, vector<128x128xbf16>
    %cst_8 = arith.constant dense<0.000000e+00> : vector<8x128xf32>
    %11 = tpu.matmul %9, %10, %cst_8 {dimension_numbers = #tpu.dot_dimension_numbers<[1], [0], [0], [1], [0, 0, 1, 1], [], []>} : vector<8x128xbf16>, vector<128x128xbf16>, vector<8x128xf32> -> vector<8x128xf32>
    %c0_9 = arith.constant 0 : index
    %c0_10 = arith.constant 0 : index
    %12 = vector.load %arg5[%c0_9, %c0_10] : memref<1x128xf32, #tpu.memory_space<vmem>>, vector<1x128xf32>
    %13 = vector.broadcast %12 : vector<1x128xf32> to vector<8x128xf32>
    %14 = arith.addf %11, %13 : vector<8x128xf32>
    %cst_11 = arith.constant 0.000000e+00 : f32
    %15 = vector.broadcast %cst_11 : f32 to vector<8x128xf32>
    %16 = arith.maximumf %14, %15 : vector<8x128xf32>
    %17 = arith.truncf %16 : vector<8x128xf32> to vector<8x128xbf16>
    %c0_12 = arith.constant 0 : index
    %c0_13 = arith.constant 0 : index
    %18 = vector.load %arg6[%c0_12, %c0_13] : memref<128x128xbf16, #tpu.memory_space<vmem>>, vector<128x128xbf16>
    %cst_14 = arith.constant dense<0.000000e+00> : vector<8x128xf32>
    %19 = tpu.matmul %17, %18, %cst_14 {dimension_numbers = #tpu.dot_dimension_numbers<[1], [0], [0], [1], [0, 0, 1, 1], [], []>} : vector<8x128xbf16>, vector<128x128xbf16>, vector<8x128xf32> -> vector<8x128xf32>
    %c0_15 = arith.constant 0 : index
    %c0_16 = arith.constant 0 : index
    %20 = vector.load %arg7[%c0_15, %c0_16] : memref<1x128xf32, #tpu.memory_space<vmem>>, vector<1x128xf32>
    %21 = vector.broadcast %20 : vector<1x128xf32> to vector<8x128xf32>
    %22 = arith.addf %19, %21 : vector<8x128xf32>
    %cst_17 = arith.constant 0.000000e+00 : f32
    %23 = vector.broadcast %cst_17 : f32 to vector<8x128xf32>
    %24 = arith.maximumf %22, %23 : vector<8x128xf32>
    %25 = arith.truncf %24 : vector<8x128xf32> to vector<8x128xbf16>
    %c0_18 = arith.constant 0 : index
    %c0_19 = arith.constant 0 : index
    %26 = vector.load %arg8[%c0_18, %c0_19] : memref<128x128xbf16, #tpu.memory_space<vmem>>, vector<128x128xbf16>
    %cst_20 = arith.constant dense<0.000000e+00> : vector<8x128xf32>
    %27 = tpu.matmul %25, %26, %cst_20 {dimension_numbers = #tpu.dot_dimension_numbers<[1], [0], [0], [1], [0, 0, 1, 1], [], []>} : vector<8x128xbf16>, vector<128x128xbf16>, vector<8x128xf32> -> vector<8x128xf32>
    %c0_21 = arith.constant 0 : index
    %c0_22 = arith.constant 0 : index
    %28 = vector.load %arg9[%c0_21, %c0_22] : memref<1x128xf32, #tpu.memory_space<vmem>>, vector<1x128xf32>
    %29 = vector.broadcast %28 : vector<1x128xf32> to vector<8x128xf32>
    %30 = arith.addf %27, %29 : vector<8x128xf32>
    %cst_23 = arith.constant dense<0xFF800000> : vector<8xf32>
    %31 = vector.multi_reduction <maximumf>, %30, %cst_23 [1] : vector<8x128xf32> to vector<8xf32>
    %32 = vector.shape_cast %31 : vector<8xf32> to vector<8x1xf32>
    %33 = vector.broadcast %32 : vector<8x1xf32> to vector<8x128xf32>
    %34 = arith.subf %30, %33 : vector<8x128xf32>
    %35 = math.exp %34 : vector<8x128xf32>
    %cst_24 = arith.constant dense<0.000000e+00> : vector<8xf32>
    %36 = vector.multi_reduction <add>, %35, %cst_24 [1] : vector<8x128xf32> to vector<8xf32>
    %37 = vector.shape_cast %36 : vector<8xf32> to vector<8x1xf32>
    %38 = tpu.reciprocal %37 : vector<8x1xf32> -> vector<8x1xf32>
    %39 = vector.broadcast %38 : vector<8x1xf32> to vector<8x128xf32>
    %40 = arith.mulf %35, %39 : vector<8x128xf32>
    %41 = arith.truncf %40 : vector<8x128xf32> to vector<8x128xbf16>
    %c0_25 = arith.constant 0 : index
    %c0_26 = arith.constant 0 : index
    %42 = vector.load %arg10[%c0_25, %c0_26] : memref<8x128xbf16, #tpu.memory_space<vmem>>, vector<8x128xbf16>
    tpu.vector_store %arg10[%c0_25, %c0_26], %41 {strides = array<i32>} : memref<8x128xbf16, #tpu.memory_space<vmem>>, vector<8x128xbf16>,
    return
  }
  func.func @transform_0(%arg0: i32) -> (i32, i32) {
    %c0_i32 = arith.constant 0 : i32
    %c0_i32_0 = arith.constant 0 : i32
    return %arg0, %c0_i32 : i32, i32
  }
  func.func @transform_1(%arg0: i32) -> (i32, i32) {
    %c0_i32 = arith.constant 0 : i32
    %c0_i32_0 = arith.constant 0 : i32
    %c0_i32_1 = arith.constant 0 : i32
    return %c0_i32, %c0_i32_0 : i32, i32
  }
  func.func @transform_2(%arg0: i32) -> (i32, i32) {
    %c0_i32 = arith.constant 0 : i32
    %c0_i32_0 = arith.constant 0 : i32
    %c0_i32_1 = arith.constant 0 : i32
    return %c0_i32, %c0_i32_0 : i32, i32
  }
  func.func @transform_3(%arg0: i32) -> (i32, i32) {
    %c0_i32 = arith.constant 0 : i32
    %c0_i32_0 = arith.constant 0 : i32
    %c0_i32_1 = arith.constant 0 : i32
    return %c0_i32, %c0_i32_0 : i32, i32
  }
  func.func @transform_4(%arg0: i32) -> (i32, i32) {
    %c0_i32 = arith.constant 0 : i32
    %c0_i32_0 = arith.constant 0 : i32
    %c0_i32_1 = arith.constant 0 : i32
    return %c0_i32, %c0_i32_0 : i32, i32
  }
  func.func @transform_5(%arg0: i32) -> (i32, i32) {
    %c0_i32 = arith.constant 0 : i32
    %c0_i32_0 = arith.constant 0 : i32
    %c0_i32_1 = arith.constant 0 : i32
    return %c0_i32, %c0_i32_0 : i32, i32
  }
  func.func @transform_6(%arg0: i32) -> (i32, i32) {
    %c0_i32 = arith.constant 0 : i32
    %c0_i32_0 = arith.constant 0 : i32
    %c0_i32_1 = arith.constant 0 : i32
    return %c0_i32, %c0_i32_0 : i32, i32
  }
  func.func @transform_7(%arg0: i32) -> (i32, i32) {
    %c0_i32 = arith.constant 0 : i32
    %c0_i32_0 = arith.constant 0 : i32
    %c0_i32_1 = arith.constant 0 : i32
    return %c0_i32, %c0_i32_0 : i32, i32
  }
  func.func @transform_8(%arg0: i32) -> (i32, i32) {
    %c0_i32 = arith.constant 0 : i32
    %c0_i32_0 = arith.constant 0 : i32
    %c0_i32_1 = arith.constant 0 : i32
    return %c0_i32, %c0_i32_0 : i32, i32
  }
  func.func @transform_9(%arg0: i32) -> (i32, i32) {
    %c0_i32 = arith.constant 0 : i32
    %c0_i32_0 = arith.constant 0 : i32
    return %arg0, %c0_i32 : i32, i32
  }
}

</mosaic_0001>

<bundles_post_ra>
// kernel: mlp_forward.1
= control target key start
LH: loop header
LB: loop body
LE: loop exit
PB: predicated region body
PF: predicated region fallthrough
CT: control target
= control target key end

     0   :  { %v1282_v44 = vmov 0.0   ;;  %vm1283_vm0 = vmmov 0   ;;  %vm446_vm1 = vcmask 130048   ;;  %s1622_s1 = inlined_call_operand.vmem [shape: bf16[784,128], index: 1, kind: input, shape index: {}]   ;;  %s1623_s0 = inlined_call_operand.vmem [shape: f32[8,784], index: 0, kind: input, shape index: {}]   ;;  %s1624_s3 = inlined_call_operand.vmem [shape: bf16[128,128], index: 3, kind: input, shape index: {}]   ;;  %s1625_s5 = inlined_call_operand.vmem [shape: bf16[128,128], index: 5, kind: input, shape index: {}]   ;;  %s1626_s2 = inlined_call_operand.vmem [shape: f32[1,128], index: 2, kind: input, shape index: {}]   ;;  %s1627_s7 = inlined_call_operand.vmem [shape: bf16[128,128], index: 7, kind: input, shape index: {}]   ;;  %s1628_s4 = inlined_call_operand.vmem [shape: f32[1,128], index: 4, kind: input, shape index: {}]   ;;  %s1629_s6 = inlined_call_operand.vmem [shape: f32[1,128], index: 6, kind: input, shape index: {}]   ;;  %s1630_s8 = inlined_call_operand.vmem [shape: f32[1,128], index: 8, kind: input, shape index: {}]   ;;  %s1631_s9 = inlined_call_operand.vmem [shape: bf16[8,128], index: 9, kind: output, shape index: {}]  }
   0x1   :  { %v1205_v0 = vld [vmem:[%s1622_s1 + $0x40] sm:$0xff]   ;;  %v1209_v4 = vld [vmem:[%s1622_s1 + $0x48] sm:$0xff]   ;;  %v1213_v8 = vld [vmem:[%s1622_s1 + $0x50] sm:$0xff]  }
   0x2   :  { %v1206_v1 = vld [vmem:[%s1622_s1] sm:$0xff]   ;;  %1042 = vmatprep.subr.bf16.mxu0 %v1205_v0  ;;  %v1210_v5 = vld [vmem:[%s1622_s1 + $0x8] sm:$0xff]   ;;  %v1214_v9 = vld [vmem:[%s1622_s1 + $0x10] sm:$0xff]  }
   0x3   :  { %v1207_v2 = vld [vmem:[%s1622_s1 + $0xc0] sm:$0xff]   ;;  %1043 = vmatpush3.bf16.msra.mxu0 %v1206_v1  ;;  %v1211_v6 = vld [vmem:[%s1622_s1 + $0xc8] sm:$0xff]   ;;  %v1215_v10 = vld [vmem:[%s1622_s1 + $0xd0] sm:$0xff]  }
   0x4   :  { %v1208_v3 = vld [vmem:[%s1622_s1 + $0x80] sm:$0xff]   ;;  %1064 = vmatprep.subr.bf16.mxu1 %v1207_v2  ;;  %1044 = vmatprep.subr.bf16.mxu0 %v1209_v4  ;;  %v1212_v7 = vld [vmem:[%s1622_s1 + $0x88] sm:$0xff]   ;;  %v1216_v11 = vld [vmem:[%s1622_s1 + $0x90] sm:$0xff]  }
   0x5   :  { %1065 = vmatpush3.bf16.msra.mxu1 %v1208_v3  ;;  %v1217_v12 = vld [vmem:[%s1622_s1 + $0x58] sm:$0xff]   ;;  %v1221_v16 = vld [vmem:[%s1622_s1 + $0x60] sm:$0xff]   ;;  %v1225_v20 = vld [vmem:[%s1622_s1 + $0x68] sm:$0xff]  }
   0x6   :  { %1066 = vmatprep.subr.bf16.mxu1 %v1211_v6  ;;  %v1218_v13 = vld [vmem:[%s1622_s1 + $0x18] sm:$0xff]   ;;  %v1222_v17 = vld [vmem:[%s1622_s1 + $0x20] sm:$0xff]   ;;  %v1226_v21 = vld [vmem:[%s1622_s1 + $0x28] sm:$0xff]  }
   0x7   :  { %1045 = vmatpush3.bf16.msra.mxu0 %v1210_v5  ;;  %v1219_v14 = vld [vmem:[%s1622_s1 + $0xd8] sm:$0xff]   ;;  %v1223_v18 = vld [vmem:[%s1622_s1 + $0xe0] sm:$0xff]   ;;  %v1227_v22 = vld [vmem:[%s1622_s1 + $0xe8] sm:$0xff]  }
   0x8   :  { %1046 = vmatprep.subr.bf16.mxu0 %v1213_v8  ;;  %v1220_v15 = vld [vmem:[%s1622_s1 + $0x98] sm:$0xff]   ;;  %v1224_v19 = vld [vmem:[%s1622_s1 + $0xa0] sm:$0xff]   ;;  %v1228_v23 = vld [vmem:[%s1622_s1 + $0xa8] sm:$0xff]  }
   0x9   :  { %1067 = vmatpush3.bf16.msra.mxu1 %v1212_v7  ;;  %v1229_v24 = vld [vmem:[%s1622_s1 + $0x70] sm:$0xff]   ;;  %v1233_v28 = vld [vmem:[%s1622_s1 + $0x78] sm:$0xff]   ;;  %v34_v31 = vld [vmem:[%s1623_s0 + $0x8] sm:$0xff] }
   0xa   :  { %1068 = vmatprep.subr.bf16.mxu1 %v1215_v10  ;;  %v1230_v25 = vld [vmem:[%s1622_s1 + $0x30] sm:$0xff]   ;;  %v1234_v29 = vld [vmem:[%s1622_s1 + $0x38] sm:$0xff]   ;;  %v41_v32 = vpack.c.bf16 %v34_v31, %v34_v31  ;;  %v33_v34 = vld [vmem:[%s1623_s0] sm:$0xff] }
   0xb   :  { %1047 = vmatpush3.bf16.msra.mxu0 %v1214_v9  ;;  %v1231_v26 = vld [vmem:[%s1622_s1 + $0xf0] sm:$0xff]   ;;  %v1235_v30 = vld [vmem:[%s1622_s1 + $0xf8] sm:$0xff]   ;;  %v40_v35 = vpack.c.bf16 %v33_v34, %v33_v34  ;;  %v1237_v36 = vld [vmem:[%s1622_s1 + $0x140] sm:$0xff]  }
   0xc   :  { %1048 = vmatprep.subr.bf16.mxu0 %v1217_v12  ;;  %v1232_v27 = vld [vmem:[%s1622_s1 + $0xb0] sm:$0xff]   ;;  %v1236_v33 = vld [vmem:[%s1622_s1 + $0xb8] sm:$0xff]   ;;  %482 = vmatprep.mubr.bf16.mxu0 %v41_v32  ;;  %v1238_v39 = vld [vmem:[%s1622_s1 + $0x100] sm:$0xff]  }
   0xd   :  { %1069 = vmatpush3.bf16.msra.mxu1 %v1216_v11  ;;  %v36_v37 = vld [vmem:[%s1623_s0 + $0x18] sm:$0xff]  ;;  %v35_v40 = vld [vmem:[%s1623_s0 + $0x10] sm:$0xff]  ;;  %v1239_v42 = vld [vmem:[%s1622_s1 + $0x148] sm:$0xff]  }
   0xe   :  { %1070 = vmatprep.subr.bf16.mxu1 %v1219_v14  ;;  %v43_v38 = vpack.c.bf16 %v36_v37, %v36_v37  ;;  %v42_v41 = vpack.c.bf16 %v35_v40, %v35_v40  ;;  %v1240_v43 = vld [vmem:[%s1622_s1 + $0x108] sm:$0xff]   ;;  %v1241_v45 = vld [vmem:[%s1622_s1 + $0x150] sm:$0xff]   ;;  %v1243_v47 = vld [vmem:[%s1622_s1 + $0x158] sm:$0xff]  }
   0xf   :  { %1049 = vmatpush3.bf16.msra.mxu0 %v1218_v13  ;;  %v1242_v46 = vld [vmem:[%s1622_s1 + $0x110] sm:$0xff]   ;;  %v1244_v48 = vld [vmem:[%s1622_s1 + $0x118] sm:$0xff]   ;;  %v1245_v49 = vld [vmem:[%s1622_s1 + $0x160] sm:$0xff]  }
  0x10   :  { %1050 = vmatprep.subr.bf16.mxu0 %v1221_v16  ;;  %522 = vmatprep.mubr.bf16.mxu1 %v43_v38  ;;  %v1246_v50 = vld [vmem:[%s1622_s1 + $0x120] sm:$0xff]   ;;  %v1247_v51 = vld [vmem:[%s1622_s1 + $0x168] sm:$0xff]   ;;  %v39_v55 = vld [vmem:[%s1623_s0 + $0x30] sm:$0xff] }
  0x11   :  { %1071 = vmatpush3.bf16.msra.mxu1 %v1220_v15  ;;  %v1253_v52 = vld [vmem:[%s1622_s1 + $0x180] sm:$0xff]   ;;  %v38_v53 = vld [vmem:[%s1623_s0 + $0x28] sm:$0xff]  ;;  %v46_v57 = vpack.c.bf16 %v39_v55, %v39_v55  ;;  %v1249_v58 = vld [vmem:[%s1622_s1 + $0x170] sm:$0xff]  }
  0x12   :  { %1072 = vmatprep.subr.bf16.mxu1 %v1223_v18  ;;  %v45_v54 = vpack.c.bf16 %v38_v53, %v38_v53  ;;  %v1248_v56 = vld [vmem:[%s1622_s1 + $0x128] sm:$0xff]   ;;  %v1250_v59 = vld [vmem:[%s1622_s1 + $0x130] sm:$0xff]   ;;  %v1251_v60 = vld [vmem:[%s1622_s1 + $0x178] sm:$0xff]  }
  0x13   :  { %1051 = vmatpush3.bf16.msra.mxu0 %v1222_v17  ;;  %v1252_v61 = vld [vmem:[%s1622_s1 + $0x138] sm:$0xff]   ;;  %v37_v62 = vld [vmem:[%s1623_s0 + $0x20] sm:$0xff]  ;;  %v1255_v1 = vld [vmem:[%s1624_s3 + $0x8] sm:$0xff]  }
  0x14   :  { %1052 = vmatprep.subr.bf16.mxu0 %v1225_v20  ;;  %v44_v63 = vpack.c.bf16 %v37_v62, %v37_v62  ;;  %v1254_v0 = vld [vmem:[%s1624_s3] sm:$0xff]   ;;  %v1256_v2 = vld [vmem:[%s1624_s3 + $0x10] sm:$0xff]   ;;  %v1257_v3 = vld [vmem:[%s1624_s3 + $0x18] sm:$0xff]  }
  0x15   :  { %1073 = vmatpush3.bf16.msra.mxu1 %v1224_v19  ;;  %v1258_v4 = vld [vmem:[%s1624_s3 + $0x20] sm:$0xff]   ;;  %v1259_v5 = vld [vmem:[%s1624_s3 + $0x28] sm:$0xff]   ;;  %v1260_v6 = vld [vmem:[%s1624_s3 + $0x30] sm:$0xff]  }
  0x16   :  { %1074 = vmatprep.subr.bf16.mxu1 %v1227_v22  ;;  %v1261_v7 = vld [vmem:[%s1624_s3 + $0x38] sm:$0xff]   ;;  %v1262_v8 = vld [vmem:[%s1625_s5] sm:$0xff]   ;;  %v1263_v9 = vld [vmem:[%s1625_s5 + $0x8] sm:$0xff]  }
  0x17   :  { %1053 = vmatpush3.bf16.msra.mxu0 %v1226_v21  ;;  %v1264_v10 = vld [vmem:[%s1625_s5 + $0x10] sm:$0xff]   ;;  %v1265_v11 = vld [vmem:[%s1625_s5 + $0x18] sm:$0xff]   ;;  %v1266_v12 = vld [vmem:[%s1625_s5 + $0x20] sm:$0xff]  }
  0x18   :  { %1054 = vmatprep.subr.bf16.mxu0 %v1229_v24  ;;  %v1267_v13 = vld [vmem:[%s1625_s5 + $0x28] sm:$0xff]   ;;  %v964_v15 = vld [vmem:[%s1626_s2] ss:$0 sm:$0xff]  ;;  %v1268_v40 = vld [vmem:[%s1625_s5 + $0x30] sm:$0xff]  }
  0x19   :  { %1075 = vmatpush3.bf16.msra.mxu1 %v1228_v23 }
  0x1a   :  { %1076 = vmatprep.subr.bf16.mxu1 %v1231_v26 }
  0x1b   :  { %1055 = vmatpush3.bf16.msra.mxu0 %v1230_v25 }
  0x1c   :  { %1056 = vmatprep.subr.bf16.mxu0 %v1233_v28 }
  0x1d   :  { %1077 = vmatpush3.bf16.msra.mxu1 %v1232_v27 }
  0x1e   :  { %1078 = vmatprep.subr.bf16.mxu1 %v1235_v30 }
  0x1f   :  { %1057 = vmatpush3.bf16.msra.mxu0 %v1234_v29 }
  0x20   :  { %1086 = vmatprep.subr.bf16.mxu0 %v1237_v36 }
  0x21   :  { %1079 = vmatpush3.bf16.msra.mxu1 %v1236_v33 }
  0x22   :  { %483 = vmatmul.mubr.bf16.vlgmr.msra.gmra.mrb[0].mxu0 %v40_v35  ;;  %1137 = vmatprep.subr.bf16.mxu1 %v1282_v44 }
  0x23   :  { %1087 = vmatpush3.bf16.msra.mxu0 %v1238_v39  ;;  %562 = vmatprep.mubr.bf16.mxu0 %v45_v54 }
  0x24   :  { %523 = vmatmul.mubr.bf16.vlgmr.msra.gmra.mrb[0].mxu1 %v42_v41  ;;  %1088 = vmatprep.subr.bf16.mxu0 %v1239_v42  ;;  %v1269_v41 = vld [vmem:[%s1625_s5 + $0x38] sm:$0xff]   ;;  %v1270_v42 = vld [vmem:[%s1627_s7] sm:$0xff]  }
  0x25   :  { %1139 = vmatprep.mubr.msk.bf16.mxu1 %vm1283_vm0, %v1282_v44  ;;  %1138 = vmatpush3.bf16.msra.mxu1 %v1253_v52 }
  0x26   :  { %1143 = vmatprep.subr.bf16.mxu1 %v1282_v44 }
  0x27   :  { %1089 = vmatpush3.bf16.msra.mxu0 %v1240_v43  ;;  %v1271_v43 = vld [vmem:[%s1627_s7 + $0x8] sm:$0xff]  }
  0x28   :  { %1090 = vmatprep.subr.bf16.mxu0 %v1241_v45  ;;  %v1272_v45 = vld [vmem:[%s1627_s7 + $0x10] sm:$0xff]  }
  0x2b   :  { %1091 = vmatpush3.bf16.msra.mxu0 %v1242_v46  ;;  %v1273_v46 = vld [vmem:[%s1627_s7 + $0x18] sm:$0xff]  }
  0x2c   :  { %1092 = vmatprep.subr.bf16.mxu0 %v1243_v47  ;;  %1140 = vmatmul.mubr.msk.bf16.vlgmr.msra.gmra.mrb[4].mxu1 %vm446_vm1, %v46_v57  ;;  %v1274_v47 = vld [vmem:[%s1627_s7 + $0x20] sm:$0xff]   ;;  %v1276_v57 = vld [vmem:[%s1627_s7 + $0x30] sm:$0xff]  }
  0x2d   :  { %1159 = vmatprep.mubr.msk.bf16.mxu1 %vm1283_vm0, %v1282_v44  ;;  %1144 = vmatpush3.bf16.msra.mxu1 %v1254_v0 }
  0x2e   :  { %1145 = vmatprep.subr.bf16.mxu1 %v1282_v44 }
  0x2f   :  { %1093 = vmatpush3.bf16.msra.mxu0 %v1244_v48  ;;  %v1275_v48 = vld [vmem:[%s1627_s7 + $0x28] sm:$0xff]  }
  0x30   :  { %1094 = vmatprep.subr.bf16.mxu0 %v1245_v49  ;;  %v1015_v49 = vld [vmem:[%s1628_s4] ss:$0 sm:$0xff] }
  0x31   :  { %1146 = vmatpush3.bf16.msra.mxu1 %v1255_v1 }
  0x32   :  { %1147 = vmatprep.subr.bf16.mxu1 %v1282_v44 }
  0x33   :  { %1095 = vmatpush3.bf16.msra.mxu0 %v1246_v50 }
  0x34   :  { %1096 = vmatprep.subr.bf16.mxu0 %v1247_v51 }
  0x35   :  { %1148 = vmatpush3.bf16.msra.mxu1 %v1256_v2 }
  0x36   :  { %1149 = vmatprep.subr.bf16.mxu1 %v1282_v44 }
  0x37   :  { %1097 = vmatpush3.bf16.msra.mxu0 %v1248_v56 }
  0x38   :  { %1098 = vmatprep.subr.bf16.mxu0 %v1249_v58  ;;  %v1277_v58 = vld [vmem:[%s1627_s7 + $0x38] sm:$0xff]  }
  0x39   :  { %1150 = vmatpush3.bf16.msra.mxu1 %v1257_v3 }
  0x3a   :  { %1151 = vmatprep.subr.bf16.mxu1 %v1282_v44 }
  0x3b   :  { %1099 = vmatpush3.bf16.msra.mxu0 %v1250_v59  ;;  %v1024_v59 = vld [vmem:[%s1629_s6] ss:$0 sm:$0xff] }
  0x3c   :  { %1100 = vmatprep.subr.bf16.mxu0 %v1251_v60 }
  0x3d   :  { %1152 = vmatpush3.bf16.msra.mxu1 %v1258_v4 }
  0x3e   :  { %1153 = vmatprep.subr.bf16.mxu1 %v1282_v44 }
  0x3f   :  { %1101 = vmatpush3.bf16.msra.mxu0 %v1252_v61 }
  0x40   :  { %1163 = vmatprep.subr.bf16.mxu0 %v1282_v44 }
  0x41   :  { %1154 = vmatpush3.bf16.msra.mxu1 %v1259_v5 }
  0x42   :  { %563 = vmatmul.mubr.bf16.vlgmr.msra.gmra.mrb[4].mxu0 %v44_v63  ;;  %1155 = vmatprep.subr.bf16.mxu1 %v1282_v44 }
  0x43   :  { %1179 = vmatprep.mubr.msk.bf16.mxu0 %vm1283_vm0, %v1282_v44  ;;  %1164 = vmatpush3.bf16.msra.mxu0 %v1262_v8 }
  0x44   :  { %1165 = vmatprep.subr.bf16.mxu0 %v1282_v44 }
  0x45   :  { %1156 = vmatpush3.bf16.msra.mxu1 %v1260_v6 }
  0x46   :  { %1157 = vmatprep.subr.bf16.mxu1 %v1282_v44 }
  0x47   :  { %1166 = vmatpush3.bf16.msra.mxu0 %v1263_v9 }
  0x48   :  { %1167 = vmatprep.subr.bf16.mxu0 %v1282_v44 }
  0x49   :  { %1158 = vmatpush3.bf16.msra.mxu1 %v1261_v7 }
  0x4a   :  { %1183 = vmatprep.subr.bf16.mxu1 %v1282_v44 }
  0x4b   :  { %1168 = vmatpush3.bf16.msra.mxu0 %v1264_v10 }
  0x4c   :  { %1169 = vmatprep.subr.bf16.mxu0 %v1282_v44 }
  0x4f   :  { %1170 = vmatpush3.bf16.msra.mxu0 %v1265_v11 }
  0x50   :  { %1171 = vmatprep.subr.bf16.mxu0 %v1282_v44 }
  0x53   :  { %1172 = vmatpush3.bf16.msra.mxu0 %v1266_v12 }
  0x54   :  { %1173 = vmatprep.subr.bf16.mxu0 %v1282_v44 }
  0x57   :  { %1174 = vmatpush3.bf16.msra.mxu0 %v1267_v13 }
  0x58   :  { %1175 = vmatprep.subr.bf16.mxu0 %v1282_v44 }
  0x5b   :  { %1176 = vmatpush3.bf16.msra.mxu0 %v1268_v40 }
  0x5c   :  { %1177 = vmatprep.subr.bf16.mxu0 %v1282_v44 }
  0x5f   :  { %1178 = vmatpush3.bf16.msra.mxu0 %v1269_v41 }
  0xf5   :  { %v1058_v14 = vpop.f32.mrb[0].mxu0 }
  0xf6   :  { %v1059_v16 = vpop.f32.mrb[1].mxu0 }
  0xf7   :  { %v1060_v17 = vadd.f32 %v1059_v16, %v1058_v14  ;;  %v1061_v18 = vpop.f32.mrb[2].mxu0  ;;  %v1080_v19 = vpop.f32.mrb[0].mxu1 }
  0xf8   :  { %v1062_v20 = vpop.f32.mrb[3].mxu0  ;;  %v1081_v22 = vpop.f32.mrb[1].mxu1 }
  0xf9   :  { %v485_v21 = vadd.f32 %v1060_v17, %v964_v15  ;;  %v1082_v23 = vadd.f32 %v1081_v22, %v1080_v19  ;;  %v1083_v24 = vpop.f32.mrb[2].mxu1 }
  0xfa   :  { %v1084_v25 = vpop.f32.mrb[3].mxu1 }
  0xfb   :  { %v525_v26 = vadd.f32 %v1082_v23, %v485_v21 }
  0xff   :  { %v604_v27 = vpop.f32.mrb[4].mxu1 }
 0x100   :  { %v1141_v28 = vpop.f32.mrb[5].mxu1 }
 0x101   :  { %v607_v29 = vpop.f32.mrb[6].mxu1 }
 0x102   :  { %v1142_v30 = vpop.f32.mrb[7].mxu1 }
 0x115   :  { %v1102_v31 = vpop.f32.mrb[4].mxu0 }
 0x116   :  { %v1103_v32 = vpop.f32.mrb[5].mxu0 }
 0x117   :  { %v1104_v33 = vadd.f32 %v1103_v32, %v1102_v31  ;;  %v1105_v34 = vpop.f32.mrb[6].mxu0 }
 0x118   :  { %v1106_v35 = vpop.f32.mrb[7].mxu0 }
 0x119   :  { %v565_v36 = vadd.f32 %v1104_v33, %v525_v26 }
 0x11b   :  { %v605_v37 = vadd.f32 %v604_v27, %v565_v36 }
 0x11d   :  { %v610_v38 = vmax.f32 %v605_v37, 0.0 }
 0x11f   :  { %v611_v39 = vpack.c.bf16 %v610_v38, %v610_v38 }
 0x121   :  { %1160 = vmatmul.mubr.bf16.vlgmr.msra.gmra.mrb[8].mxu1 %v611_v39 }
 0x122   :  { %1199 = vmatprep.mubr.msk.bf16.mxu1 %vm1283_vm0, %v1282_v44  ;;  %1184 = vmatpush3.bf16.msra.mxu1 %v1270_v42 }
 0x123   :  { %1185 = vmatprep.subr.bf16.mxu1 %v1282_v44 }
 0x126   :  { %1186 = vmatpush3.bf16.msra.mxu1 %v1271_v43 }
 0x127   :  { %1187 = vmatprep.subr.bf16.mxu1 %v1282_v44 }
 0x12a   :  { %1188 = vmatpush3.bf16.msra.mxu1 %v1272_v45 }
 0x12b   :  { %1189 = vmatprep.subr.bf16.mxu1 %v1282_v44 }
 0x12e   :  { %1190 = vmatpush3.bf16.msra.mxu1 %v1273_v46 }
 0x12f   :  { %1191 = vmatprep.subr.bf16.mxu1 %v1282_v44 }
 0x132   :  { %1192 = vmatpush3.bf16.msra.mxu1 %v1274_v47 }
 0x133   :  { %1193 = vmatprep.subr.bf16.mxu1 %v1282_v44 }
 0x136   :  { %1194 = vmatpush3.bf16.msra.mxu1 %v1275_v48 }
 0x137   :  { %1195 = vmatprep.subr.bf16.mxu1 %v1282_v44 }
 0x13a   :  { %1196 = vmatpush3.bf16.msra.mxu1 %v1276_v57 }
 0x13b   :  { %1197 = vmatprep.subr.bf16.mxu1 %v1282_v44  ;;  %v1033_v44 = vld [vmem:[%s1630_s8] ss:$0 sm:$0xff] }
 0x13e   :  { %1198 = vmatpush3.bf16.msra.mxu1 %v1277_v58 }
 0x1f4   :  { %v717_v50 = vpop.f32.mrb[8].mxu1 }
 0x1f5   :  { %v718_v51 = vadd.f32 %v1015_v49, %v717_v50  ;;  %v1161_v52 = vpop.f32.mrb[9].mxu1 }
 0x1f6   :  { %v720_v53 = vpop.f32.mrb[10].mxu1 }
 0x1f7   :  { %v723_v54 = vmax.f32 %v718_v51, 0.0  ;;  %v1162_v55 = vpop.f32.mrb[11].mxu1 }
 0x1f9   :  { %v724_v56 = vpack.c.bf16 %v723_v54, %v723_v54 }
 0x1fb   :  { %1180 = vmatmul.mubr.bf16.vlgmr.msra.gmra.mrb[8].mxu0 %v724_v56 }
 0x2ce   :  { %v830_v60 = vpop.f32.mrb[8].mxu0 }
 0x2cf   :  { %v831_v61 = vadd.f32 %v1024_v59, %v830_v60  ;;  %v1181_v62 = vpop.f32.mrb[9].mxu0 }
 0x2d0   :  { %v833_v63 = vpop.f32.mrb[10].mxu0 }
 0x2d1   :  { %v836_v0 = vmax.f32 %v831_v61, 0.0  ;;  %v1182_v1 = vpop.f32.mrb[11].mxu0 }
 0x2d3   :  { %v837_v2 = vpack.c.bf16 %v836_v0, %v836_v0 }
 0x2d5   :  { %1200 = vmatmul.mubr.bf16.vlgmr.msra.gmra.mrb[12].mxu1 %v837_v2 }
 0x3a8   :  { %v943_v3 = vpop.f32.mrb[12].mxu1 }
 0x3a9   :  { %v944_v4 = vadd.f32 %v1033_v44, %v943_v3  ;;  %v1201_v5 = vpop.f32.mrb[13].mxu1 }
 0x3aa   :  { %v946_v6 = vpop.f32.mrb[14].mxu1 }
 0x3ab   :  { %949 = vmax.xlane.f32.xlu0 %v944_v4  ;;  %v1202_v7 = vpop.f32.mrb[15].mxu1 }
 0x438   :  { %v950_v8 = vpop.xlane.xlu0 %949 }
 0x439   :  { %v951_v9 = vsub.f32 %v944_v4, %v950_v8 }
 0x43b   :  { %v952_v10 = vmul.f32 1.442695, %v951_v9 }
 0x43d   :  { %1278 = vpow2.f32 %v952_v10 }
 0x447   :  { %v1279_v11 = vpop.eup %1278 }
 0x448   :  { %954 = vadd.xlane.f32.xlu0 %v1279_v11 }
 0x4d5   :  { %v955_v12 = vpop.xlane.xlu0 %954 }
 0x4d6   :  { %1280 = vrcp.f32 %v955_v12 }
 0x4e0   :  { %v1281_v13 = vpop.eup %1280 }
 0x4e1   :  { %v957_v14 = vmul.f32 %v1281_v13, %v1279_v11 }
 0x4e3   :  { %v958_v15 = vpack.c.bf16 %v957_v14, %v957_v14 }
 0x4e5   :  { %959 = vst [vmem:[%s1631_s9] sm:$0xf] %v958_v15 }

</bundles_post_ra>
